<compile_context>
chip_gen: v7x
topology: tpu7x:2x2x1
jax: 0.10.0
libtpu: 0.0.40
codegen_flags: <defaults>
</compile_context>

<pallas_src>
import functools

import jax
import jax.numpy as jnp
from jax.experimental import pallas as pl
from jax.experimental.pallas import tpu as pltpu

_LANES = 128
_COMPUTE_DTYPE = jnp.float32        # v5e VPU/EUP have no bf16 path; keep math in f32.
_SMALL_MAX_ELEMS = 64 * _LANES      # <= 8192 elems (32 KiB/input): single un-gridded block
_MAX_BLOCK_ROWS = 1024              # (1024, 128) f32 = 512 KiB per input block


def _small_kernel(losses_ref, weights_ref, out_ref, *, inv_n: float):
    # losses_ref / weights_ref: (1, n) f32 in VMEM (full-array blocks, no padding needed)
    # out_ref: (1, 1) f32 in SMEM
    l = losses_ref[...]
    w = weights_ref[...]
    result = jnp.exp(w) * l + w                       # EUP exp + VPU fma
    out_ref[0, 0] = jnp.sum(result) * jnp.float32(inv_n)


def _large_kernel(losses_ref, weights_ref, out_ref, acc_ref, *, inv_n: float):
    # losses_ref / weights_ref: (block_rows, 128) f32 tiles; zero padding contributes exactly 0.
    # out_ref: (1, 1) f32 in SMEM; acc_ref: (1, 1) f32 SMEM scratch (persists across the grid).
    pid = pl.program_id(0)

    @pl.when(pid == 0)
    def _():
        acc_ref[0, 0] = jnp.float32(0.0)

    l = losses_ref[...]
    w = weights_ref[...]
    acc_ref[0, 0] += jnp.sum(jnp.exp(w) * l + w)

    @pl.when(pid == pl.num_programs(0) - 1)
    def _():
        out_ref[0, 0] = acc_ref[0, 0] * jnp.float32(inv_n)


def adaptive_multi_loss(losses: jax.Array, weights: jax.Array) -> jax.Array:
    """Combined (balanced) loss: mean(exp(weights) * losses + weights)."""
    assert losses.shape == weights.shape
    assert losses.ndim == 1
    n = losses.shape[0]
    if n < 1:
        raise ValueError("num_losses must be >= 1 (module requires >= 2)")

    if losses.dtype != _COMPUTE_DTYPE:
        losses = losses.astype(_COMPUTE_DTYPE)
    if weights.dtype != _COMPUTE_DTYPE:
        weights = weights.astype(_COMPUTE_DTYPE)

    inv_n = 1.0 / float(n)

    if n <= _SMALL_MAX_ELEMS:
        # ---- Small path: two whole-array VMEM inputs, no wrapper-side pad/stack. ----
        cost = pl.CostEstimate(
            flops=3 * n,
            transcendentals=n,
            bytes_accessed=2 * n * 4 + 4,
        )
        out = pl.pallas_call(
            functools.partial(_small_kernel, inv_n=inv_n),
            out_shape=jax.ShapeDtypeStruct((1, 1), jnp.float32),
            in_specs=[
                pl.BlockSpec(memory_space=pltpu.VMEM),
                pl.BlockSpec(memory_space=pltpu.VMEM),
            ],
            out_specs=pl.BlockSpec(memory_space=pltpu.SMEM),
            cost_estimate=cost,
        )(losses.reshape(1, n), weights.reshape(1, n))
        return jnp.reshape(out, ())

    # ---- Large path: 1-D grid over lane-dense row blocks with an accumulator. ----
    rows = pl.cdiv(n, _LANES)
    # Block rows: multiple of 8, capped at _MAX_BLOCK_ROWS, no larger than needed.
    block_rows = min(_MAX_BLOCK_ROWS, ((rows + 7) // 8) * 8)
    num_blocks = pl.cdiv(rows, block_rows)
    rows_padded = num_blocks * block_rows
    n_padded = rows_padded * _LANES

    pad = n_padded - n
    losses_p = jnp.pad(losses, (0, pad)).reshape(rows_padded, _LANES)
    weights_p = jnp.pad(weights, (0, pad)).reshape(rows_padded, _LANES)

    cost = pl.CostEstimate(
        flops=3 * n_padded,
        transcendentals=n_padded,
        bytes_accessed=2 * n_padded * 4 + 4,
    )

    out = pl.pallas_call(
        functools.partial(_large_kernel, inv_n=inv_n),
        out_shape=jax.ShapeDtypeStruct((1, 1), jnp.float32),
        grid=(num_blocks,),
        in_specs=[
            pl.BlockSpec((block_rows, _LANES), lambda i: (i, 0)),
            pl.BlockSpec((block_rows, _LANES), lambda i: (i, 0)),
        ],
        out_specs=pl.BlockSpec(memory_space=pltpu.SMEM),
        scratch_shapes=[pltpu.SMEM((1, 1), jnp.float32)],
        compiler_params=pltpu.CompilerParams(
            dimension_semantics=("arbitrary",),
        ),
        cost_estimate=cost,
    )(losses_p, weights_p)
    return jnp.reshape(out, ())


if __name__ == "__main__":
    key = jax.random.PRNGKey(0)

    # ---- Module-sized test: num_losses = 8, weights init to zeros (nn.Parameter(zeros)). ----
    num_losses = 8
    weights = jnp.zeros((num_losses,), dtype=jnp.float32)
    losses = jax.random.uniform(key, (num_losses,), dtype=jnp.float32)

    combined = jax.block_until_ready(adaptive_multi_loss(losses, weights))
    ref = jnp.mean(jnp.exp(weights) * losses + weights)
    assert jnp.allclose(combined, ref, rtol=1e-6, atol=1e-6), (combined, ref)

    # ---- Exercise the gridded large-n path once as well (still a tiny test). ----
    n_big = 20000
    k1, k2 = jax.random.split(key)
    losses_big = jax.random.uniform(k1, (n_big,), dtype=jnp.float32)
    weights_big = 0.1 * jax.random.normal(k2, (n_big,), dtype=jnp.float32)
    combined_big = jax.block_until_ready(adaptive_multi_loss(losses_big, weights_big))
    ref_big = jnp.mean(jnp.exp(weights_big) * losses_big + weights_big)
    assert jnp.allclose(combined_big, ref_big, rtol=1e-5, atol=1e-5), (combined_big, ref_big)

    print("KERNEL_OK")
</pallas_src>

<mosaic_0001>
module attributes {stable_mosaic.version = 11 : i64} {
  func.func @_small_kernel(%arg0: memref<1x8xf32, #tpu.memory_space<vmem>>, %arg1: memref<1x8xf32, #tpu.memory_space<vmem>>, %arg2: memref<1x1xf32, #tpu.memory_space<smem>>) attributes {dimension_semantics = [], scalar_prefetch = 0 : i64, scratch_operands = 0 : i64, tpu.core_type = #tpu.core_type<tc>} {
    %c0 = arith.constant 0 : index
    %c0_0 = arith.constant 0 : index
    %0 = vector.load %arg0[%c0, %c0_0] : memref<1x8xf32, #tpu.memory_space<vmem>>, vector<1x8xf32>
    %c0_1 = arith.constant 0 : index
    %c0_2 = arith.constant 0 : index
    %1 = vector.load %arg1[%c0_1, %c0_2] : memref<1x8xf32, #tpu.memory_space<vmem>>, vector<1x8xf32>
    %2 = math.exp %1 : vector<1x8xf32>
    %3 = arith.mulf %2, %0 : vector<1x8xf32>
    %4 = arith.addf %3, %1 : vector<1x8xf32>
    %5 = vector.shape_cast %4 : vector<1x8xf32> to vector<1x1x8xf32>
    %cst = arith.constant dense<0.000000e+00> : vector<1xf32>
    %6 = vector.multi_reduction <add>, %5, %cst [1, 2] : vector<1x1x8xf32> to vector<1xf32>
    %7 = vector.shape_cast %6 : vector<1xf32> to vector<1x1x1xf32>
    %8 = vector.extract %7[0, 0, 0] : f32 from vector<1x1x1xf32>
    %cst_3 = arith.constant 1.250000e-01 : f32
    %9 = arith.mulf %8, %cst_3 : f32
    %c0_4 = arith.constant 0 : index
    %c0_5 = arith.constant 0 : index
    %10 = memref.load %arg2[%c0_4, %c0_5] : memref<1x1xf32, #tpu.memory_space<smem>>
    memref.store %9, %arg2[%c0_4, %c0_5] : memref<1x1xf32, #tpu.memory_space<smem>>
    return
  }
}

</mosaic_0001>

<bundles_post_ra>
// kernel: tpu_custom_call.1
= control target key start
LH: loop header
LB: loop body
LE: loop exit
PB: predicated region body
PF: predicated region fallthrough
CT: control target
= control target key end

     0   :  { %7 = vsyncpa [#allocation3], 0  ;;  %s144_s0 = inlined_call_operand.hbm [shape: f32[1,8], index: 0, kind: input, shape index: {}]   ;;  %s145_s1 = inlined_call_operand.vmem [shape: f32[1,8], index: 1, kind: input, shape index: {}]   ;;  %s146_s2 = inlined_call_operand.hbm [shape: f32[1,1], index: 2, kind: output, shape index: {}]  }
   0x1   :  { %8 = vsyncpa [#allocation4], 0  ;;  %s100_s9 = smov [#allocation2]   ;;  %s64_s13 = scalar_lea.hbm %s144_s0, 16 }
   0x2   :  { %s15_s10 = sshll.u32 %s100_s9, 4  ;;  %p65_p0 = scmp.ne.s32.totalorder %s144_s0, %s64_s13  ;;  %s16_s10 = int_to_ptr.vmem [resolvable:$true] %s15_s10 }
   0x3   :  { %p68_p1 = scmp.lt.u32.totalorder %s64_s13, %s144_s0 }
   0x5   :  { %p70_p2 = pnand %p68_p1, %p65_p0 }
   0x7   :  { %73 = shalt.err (!%p70_p2)
}
   0x8   :  { %s74_s18 = scalar_lea.vmem %s16_s10, 16  ;;  %s78_s19 = scalar_lea.vmem %s16_s10, 32 }
   0x9   :  { %p75_p3 = scmp.ne.s32.totalorder %s16_s10, %s74_s18  ;;  %p79_p4 = scmp.lt.s32.totalorder %s16_s10, %s16_s10 }
   0xa   :  { %p80_p5 = scmp.lt.s32.totalorder %s78_s19, %s74_s18 }
   0xc   :  { %p81_p6 = por %p80_p5, %p79_p4 }
   0xe   :  { %p82_p7 = pnand %p81_p6, %p75_p3 }
  0x10   :  { %85 = shalt.err (!%p82_p7)
}
  0x11   :  { %18 = dma.hbm_to_vmem [thread:$0]  %s144_s0, 16, %s16_s10, [#allocation3]  }
  0x12   :  { %96 = dma.done.wait [#allocation3], 16  }
  0x13   :  { %97 = vsyncadd [#allocation3], 4294967280  ;;  %v25_v0 = vld [vmem:[%s145_s1] sm:$0x1]  ;;  %vm30_vm0 = vcmask 57344   ;;  %s86_s26 = scalar_lea.hbm %s146_s2, 16 }
  0x14   :  { %v26_v1 = vmul.f32 1.442695, %v25_v0  ;;  %v24_v2 = vld [vmem:[#allocation2] sm:$0x1]  ;;  %p87_p8 = scmp.ne.s32.totalorder %s146_s2, %s86_s26  ;;  %p90_p9 = scmp.lt.u32.totalorder %s86_s26, %s146_s2 }
  0x16   :  { %62 = vpow2.f32 %v26_v1  ;;  %p92_p10 = pnand %p90_p9, %p87_p8 }
  0x20   :  { %v63_v3 = vpop.eup %62 }
  0x21   :  { %v28_v4 = vmul.f32 %v63_v3, %v24_v2 }
  0x23   :  { %v29_v5 = vadd.f32 %v28_v4, %v25_v0 }
  0x25   :  { %v31_v6 = vsel %vm30_vm0, %v29_v5, 0.0 }
  0x26   :  { %32 = vadd.xlane.f32.xlu0 %v31_v6 }
  0xb3   :  { %v33_v7 = vpop.xlane.xlu0 %32 }
  0xb4   :  { %v34_v8 = vrot.slane %v33_v7, 4 }
  0xb6   :  { %v35_v9 = vadd.f32 %v34_v8, %v33_v7 }
  0xb8   :  { %v36_v10 = vrot.slane %v35_v9, 2 }
  0xba   :  { %v37_v11 = vadd.f32 %v36_v10, %v35_v9 }
  0xbc   :  { %v38_v12 = vrot.slane %v37_v11, 1 }
  0xbe   :  { %v39_v13 = vadd.f32 %v38_v12, %v37_v11 }
  0xc0   :  { %58 = vpush %v39_v13 }
  0xf1   :  { %s59_s0 = spop %58 }
  0xf2   :  { %s41_s24 = smul.f32 0.125, %s59_s0 }
  0xf4   :  { %43 = sst [smem:[#allocation5]] %s41_s24 }
  0xf5   :  { %95 = shalt.err (!%p92_p10)
}
  0xf6   :  { %s101_s3 = smov [#allocation5]  }
  0xf7   :  { %51 = dma.smem_to_hbm %s101_s3, 16, %s146_s2, [#allocation4]  }
  0xf8   :  { %98 = dma.done.wait [#allocation4], 16  }
  0xf9   :  { %99 = vsyncadd [#allocation4], 4294967280 }
  0xfa   :  { %55 = sfence }
  0xfb   :  { %56 = vsyncpa [#allocation3], 1 }
  0xfc   :  { %57 = vsyncpa [#allocation4], 1 }

</bundles_post_ra>
